<compile_context>
chip_gen: v6e
topology: v6e:2x2x1
jax: 0.10.0
libtpu: 0.0.40
codegen_flags: <defaults>
</compile_context>

<pallas_src>
import jax
import jax.numpy as jnp
from functools import partial
from jax.experimental import pallas as pl
from jax.experimental.pallas import tpu as pltpu


def _leaky_relu_kernel(x_ref, y_ref, mask_ref, *, alpha):
    x = x_ref[...]
    one = jnp.asarray(1, x.dtype)
    a = jnp.asarray(alpha, x.dtype)
    mask = jnp.where(x > 0, one, a)      # 1 where positive, alpha elsewhere
    y_ref[...] = x * mask
    mask_ref[...] = mask


def _sublane_pack(itemsize):
    # Sub-32-bit dtypes pack along sublanes: native tiles are (8,128) f32,
    # (16,128) bf16, (32,128) int8/fp8.
    return {4: 8, 2: 16, 1: 32}.get(int(itemsize), 8)


def _choose_layout(total, itemsize):
    """Pick a lane-dense (rows, lanes) view of the flattened array.

    Returns (rows, lanes, sub). rows*lanes may exceed `total`, in which case the
    caller zero-pads the flat input and slices the outputs back.
    """
    sub = _sublane_pack(itemsize)
    # Exact layouts, widest lanes first, preferring rows that are a multiple of
    # the sublane pack so tiles split cleanly into full vregs.
    for lanes in (2048, 1024, 512, 256, 128):
        if total % lanes == 0 and (total // lanes) % sub == 0:
            return total // lanes, lanes, sub
    for lanes in (2048, 1024, 512, 256, 128):
        if total % lanes == 0 and total // lanes >= sub:
            return total // lanes, lanes, sub
    # No exact lane-dense factorization: pad to 128-wide lanes with
    # sublane-aligned rows (outputs are sliced back to `total`).
    lanes = 128
    rows = pl.cdiv(total, lanes)
    rows = ((rows + sub - 1) // sub) * sub
    return rows, lanes, sub


def _choose_tile_rows(rows, cols, itemsize, sub):
    """Target ~4 MiB per tile buffer (3 streams x double buffering ~ 24 MiB),
    within the explicit 32 MiB scoped-VMEM budget (safe on v5e/v6e/v7x)."""
    target_bytes = 4 * 1024 * 1024
    target = max(sub, (target_bytes // (cols * itemsize)) // sub * sub)

    if rows % sub != 0:
        # Can't split into sublane-aligned tiles covering rows exactly; a block
        # equal to the full array shape is always legal.
        return rows

    if target >= rows:
        # Array smaller than one target tile: prefer >=2 balanced grid steps so
        # v7x megacore sharding ("parallel" axis) can engage both TensorCores.
        if rows >= 2 * sub:
            t = (rows // 2) // sub * sub
            while t > sub and rows % t != 0:
                t -= sub
            if t >= sub and rows % t == 0:
                return t
        return rows

    # Largest sublane-aligned tile <= target that divides rows evenly, so the
    # last grid step is never a masked/partial block.
    t = target
    while t > sub and rows % t != 0:
        t -= sub
    if rows % t != 0:
        return rows
    return t


def leaky_relu(x, alpha=0.1):
    """Pallas TPU implementation of LeakyReLU.forward: returns (x * mask, mask)."""
    assert alpha >= 0, "Alpha should be positive"
    orig_shape = x.shape
    total = int(x.size)
    itemsize = int(jnp.dtype(x.dtype).itemsize)

    rows, cols, sub = _choose_layout(total, itemsize)
    padded = rows * cols

    flat = jnp.ravel(x)
    if padded != total:
        flat = jnp.pad(flat, (0, padded - total))
    x2d = flat.reshape(rows, cols)

    tile_rows = _choose_tile_rows(rows, cols, itemsize, sub)
    grid = (pl.cdiv(rows, tile_rows),)

    out_shapes = (
        jax.ShapeDtypeStruct((rows, cols), x.dtype),
        jax.ShapeDtypeStruct((rows, cols), x.dtype),
    )

    y2d, mask2d = pl.pallas_call(
        partial(_leaky_relu_kernel, alpha=alpha),
        out_shape=out_shapes,
        grid=grid,
        in_specs=[pl.BlockSpec((tile_rows, cols), lambda i: (i, 0))],
        out_specs=(
            pl.BlockSpec((tile_rows, cols), lambda i: (i, 0)),
            pl.BlockSpec((tile_rows, cols), lambda i: (i, 0)),
        ),
        compiler_params=pltpu.CompilerParams(
            dimension_semantics=("parallel",),
            vmem_limit_bytes=32 * 1024 * 1024,
        ),
        cost_estimate=pl.CostEstimate(
            flops=2 * total,
            transcendentals=0,
            bytes_accessed=3 * total * itemsize,
        ),
    )(x2d)

    if padded != total:
        y = y2d.reshape(-1)[:total].reshape(orig_shape)
        mask = mask2d.reshape(-1)[:total].reshape(orig_shape)
    else:
        y = y2d.reshape(orig_shape)
        mask = mask2d.reshape(orig_shape)
    return y, mask


if __name__ == "__main__":
    key = jax.random.PRNGKey(0)
    # Small NCHW input consistent with an invertible-flow feature map.
    x = jax.random.normal(key, (2, 4, 16, 16), dtype=jnp.float32)

    y, mask = leaky_relu(x, alpha=0.1)
    jax.block_until_ready((y, mask))

    # Reference check in plain JAX (same semantics as the PyTorch module).
    ref_mask = (x > 0).astype(x.dtype)
    ref_mask = ref_mask + (1 - ref_mask) * 0.1
    ref_y = x * ref_mask
    assert jnp.allclose(y, ref_y, atol=1e-6), "output mismatch"
    assert jnp.allclose(mask, ref_mask, atol=1e-6), "mask mismatch"

    print("KERNEL_OK")
</pallas_src>

<mosaic_0001>
module attributes {stable_mosaic.version = 11 : i64} {
  func.func @_leaky_relu_kernel(%arg0: i32, %arg1: memref<8x256xf32, #tpu.memory_space<vmem>>, %arg2: memref<8x256xf32, #tpu.memory_space<vmem>>, %arg3: memref<8x256xf32, #tpu.memory_space<vmem>>) attributes {dimension_semantics = [#tpu.dimension_semantics<parallel>], iteration_bounds = array<i64: 1>, scalar_prefetch = 0 : i64, scratch_operands = 0 : i64, tpu.core_type = #tpu.core_type<tc>, window_params = [{transform_indices = @transform_0, window_bounds = array<i64: 8, 256>}, {transform_indices = @transform_1, window_bounds = array<i64: 8, 256>}, {transform_indices = @transform_2, window_bounds = array<i64: 8, 256>}]} {
    %c0 = arith.constant 0 : index
    %c0_0 = arith.constant 0 : index
    %0 = vector.load %arg1[%c0, %c0_0] : memref<8x256xf32, #tpu.memory_space<vmem>>, vector<8x256xf32>
    %cst = arith.constant 0.000000e+00 : f32
    %1 = vector.broadcast %cst : f32 to vector<8x256xf32>
    %2 = arith.cmpf ogt, %0, %1 : vector<8x256xf32>
    %cst_1 = arith.constant 1.000000e+00 : f32
    %cst_2 = arith.constant 1.000000e-01 : f32
    %3 = vector.broadcast %cst_1 : f32 to vector<8x256xf32>
    %4 = vector.broadcast %cst_2 : f32 to vector<8x256xf32>
    %5 = arith.select %2, %3, %4 : vector<8x256xi1>, vector<8x256xf32>
    %6 = arith.mulf %0, %5 : vector<8x256xf32>
    %c0_3 = arith.constant 0 : index
    %c0_4 = arith.constant 0 : index
    %7 = vector.load %arg2[%c0_3, %c0_4] : memref<8x256xf32, #tpu.memory_space<vmem>>, vector<8x256xf32>
    tpu.vector_store %arg2[%c0_3, %c0_4], %6 {strides = array<i32>} : memref<8x256xf32, #tpu.memory_space<vmem>>, vector<8x256xf32>,
    %c0_5 = arith.constant 0 : index
    %c0_6 = arith.constant 0 : index
    %8 = vector.load %arg3[%c0_5, %c0_6] : memref<8x256xf32, #tpu.memory_space<vmem>>, vector<8x256xf32>
    tpu.vector_store %arg3[%c0_5, %c0_6], %5 {strides = array<i32>} : memref<8x256xf32, #tpu.memory_space<vmem>>, vector<8x256xf32>,
    return
  }
  func.func @transform_0(%arg0: i32) -> (i32, i32) {
    %c0_i32 = arith.constant 0 : i32
    %c0_i32_0 = arith.constant 0 : i32
    return %arg0, %c0_i32 : i32, i32
  }
  func.func @transform_1(%arg0: i32) -> (i32, i32) {
    %c0_i32 = arith.constant 0 : i32
    %c0_i32_0 = arith.constant 0 : i32
    return %arg0, %c0_i32 : i32, i32
  }
  func.func @transform_2(%arg0: i32) -> (i32, i32) {
    %c0_i32 = arith.constant 0 : i32
    %c0_i32_0 = arith.constant 0 : i32
    return %arg0, %c0_i32 : i32, i32
  }
}

</mosaic_0001>

<bundles_post_ra>
// kernel: tpu_custom_call.1
= control target key start
LH: loop header
LB: loop body
LE: loop exit
PB: predicated region body
PF: predicated region fallthrough
CT: control target
= control target key end

     0   :  { %8 = vsyncpa [#allocation3], 0  ;;  %s163_s0 = inlined_call_operand.hbm [shape: f32[8,256], index: 0, kind: input, shape index: {}]   ;;  %s164_s1 = inlined_call_operand.hbm [shape: f32[8,256], index: 1, kind: output, shape index: {0}]   ;;  %s165_s2 = inlined_call_operand.hbm [shape: f32[8,256], index: 2, kind: output, shape index: {1}]  }
   0x1   :  { %9 = vsyncpa [#allocation4], 0 }
   0x2   :  { %10 = vsyncpa [#allocation7], 0  ;;  %s135_s9 = smov [#allocation2]  }
   0x3   :  { %s17_s10 = sshll.u32 %s135_s9, 4  ;;  %s18_s10 = int_to_ptr.vmem [resolvable:$true] %s17_s10 }
   0x4   :  { %s77_s11 = scalar_lea.vmem %s18_s10, 256  ;;  %p82_p1 = scmp.lt.s32.totalorder %s18_s10, %s18_s10 }
   0x5   :  { %p78_p0 = scmp.ne.s32.totalorder %s18_s10, %s77_s11  ;;  %p83_p2 = scmp.lt.s32.totalorder %s77_s11, %s77_s11 }
   0x7   :  { %p84_p3 = por %p83_p2, %p82_p1 }
   0x9   :  { %p85_p4 = pnand %p84_p3, %p78_p0 }
   0xb   :  { %88 = shalt.err (!%p85_p4)
}
   0xc   :  { %20 = dma.hbm_to_vmem [thread:$0]  %s163_s0, 256, %s18_s10, [#allocation3]  }
   0xd   :  { %129 = dma.done.wait [#allocation3], 256  }
   0xe   :  { %130 = vsyncadd [#allocation3], 4294967040  ;;  %s136_s14 = smov [#allocation6]   ;;  %v24_v0 = vld [vmem:[#allocation2] sm:$0xff]  ;;  %v25_v1 = vld [vmem:[#allocation2 + $0x8] sm:$0xff]  ;;  %s137_s16 = smov [#allocation5]  }
   0xf   :  { %s52_s15 = sshll.u32 %s136_s14, 4  ;;  %s42_s17 = sshll.u32 %s137_s16, 4  ;;  %vm26_vm0 = vcmp.gt.f32.partialorder %v24_v0, 0.0  ;;  %vm27_vm1 = vcmp.gt.f32.partialorder %v25_v1, 0.0  ;;  %v138_v2 = vmov 0.1   ;;  %s53_s15 = int_to_ptr.vmem [resolvable:$true] %s52_s15  ;;  %s43_s17 = int_to_ptr.vmem [resolvable:$true] %s42_s17 }
  0x10   :  { %v28_v3 = vsel %vm26_vm0, 1.0, %v138_v2  ;;  %v29_v4 = vsel %vm27_vm1, 1.0, %v138_v2  ;;  %s89_s0 = scalar_lea.vmem %s53_s15, 256  ;;  %p94_p6 = scmp.lt.s32.totalorder %s53_s15, %s53_s15 }
  0x11   :  { %v30_v5 = vmul.f32 %v28_v3, %v24_v0  ;;  %34 = vst [vmem:[#allocation6] sm:$0xff] %v28_v3  ;;  %v31_v6 = vmul.f32 %v29_v4, %v25_v1  ;;  %35 = vst [vmem:[#allocation6 + $0x8] sm:$0xff] %v29_v4  ;;  %p90_p5 = scmp.ne.s32.totalorder %s53_s15, %s89_s0  ;;  %p95_p7 = scmp.lt.s32.totalorder %s89_s0, %s89_s0 }
  0x13   :  { %p96_p8 = por %p95_p7, %p94_p6 }
  0x15   :  { %p97_p9 = pnand %p96_p8, %p90_p5 }
  0x17   :  { %100 = shalt.err (!%p97_p9)
}
  0x18   :  { %55 = dma.vmem_to_hbm [thread:$0]  %s53_s15, 256, %s165_s2, [#allocation7]   ;;  %32 = vst [vmem:[#allocation5] sm:$0xff] %v30_v5  ;;  %33 = vst [vmem:[#allocation5 + $0x8] sm:$0xff] %v31_v6 }
  0x19   :  { %s109_s20 = scalar_lea.vmem %s43_s17, 256  ;;  %p114_p11 = scmp.lt.s32.totalorder %s43_s17, %s43_s17 }
  0x1a   :  { %p110_p10 = scmp.ne.s32.totalorder %s43_s17, %s109_s20  ;;  %p115_p12 = scmp.lt.s32.totalorder %s109_s20, %s109_s20 }
  0x1c   :  { %p116_p13 = por %p115_p12, %p114_p11 }
  0x1e   :  { %p117_p0 = pnand %p116_p13, %p110_p10 }
  0x20   :  { %120 = shalt.err (!%p117_p0)
}
  0x21   :  { %45 = dma.vmem_to_hbm [thread:$0]  %s43_s17, 256, %s164_s1, [#allocation4]  }
  0x22   :  { %131 = dma.done.wait [#allocation4], 256  }
  0x23   :  { %132 = vsyncadd [#allocation4], 4294967040 }
  0x24   :  { %133 = dma.done.wait [#allocation7], 256  }
  0x25   :  { %134 = vsyncadd [#allocation7], 4294967040 }
  0x26   :  { %62 = vsyncpa [#allocation3], 1 }
  0x27   :  { %63 = vsyncpa [#allocation4], 1 }
  0x28   :  { %64 = vsyncpa [#allocation7], 1 }

</bundles_post_ra>
